<compile_context>
chip_gen: v7x
topology: tpu7x:2x2x1
jax: 0.10.0
libtpu: 0.0.40
codegen_flags: <defaults>
</compile_context>

<pallas_src>
import functools

import jax
import jax.numpy as jnp
from jax.experimental import pallas as pl
from jax.experimental.pallas import tpu as pltpu


# ----------------------------------------------------------------------------
# Kernel bodies: one (batch-tile, q-tile) block per grid step
# ----------------------------------------------------------------------------
def _attention_probs(q_ref, k_ref, inv_temperature):
    # Scale q (Bt, tq, Dk) instead of the scores (Bt, tq, Lk): Lk/Dk x less VALU work.
    q = q_ref[...] * inv_temperature
    k = k_ref[...]
    # scores[b, i, j] = sum_d q[b, i, d] * k[b, j, d]  (no materialized k.T; MXU batched)
    s = jnp.einsum("bqd,bkd->bqk", q, k, preferred_element_type=jnp.float32)
    # Numerically-stable softmax over the key axis (f32 VPU math).
    s = s - jnp.max(s, axis=-1, keepdims=True)
    e = jnp.exp(s)
    denom = jnp.sum(e, axis=-1, keepdims=True)
    return e * pl.reciprocal(denom, approx=True)          # EUP reciprocal


def _sdpa_kernel(q_ref, k_ref, v_ref, out_ref, attn_ref, *, inv_temperature):
    attn = _attention_probs(q_ref, k_ref, inv_temperature)      # (Bt, tq, Lk) f32
    attn_ref[...] = attn.astype(attn_ref.dtype)                 # write in input dtype
    v = v_ref[...]
    # Cast probabilities to v.dtype (bf16 path when inputs are bf16), accumulate in f32.
    out_ref[...] = jnp.einsum(
        "bqk,bkd->bqd", attn.astype(v.dtype), v,
        preferred_element_type=jnp.float32).astype(out_ref.dtype)


def _sdpa_kernel_no_attn(q_ref, k_ref, v_ref, out_ref, *, inv_temperature):
    attn = _attention_probs(q_ref, k_ref, inv_temperature)
    v = v_ref[...]
    out_ref[...] = jnp.einsum(
        "bqk,bkd->bqd", attn.astype(v.dtype), v,
        preferred_element_type=jnp.float32).astype(out_ref.dtype)


# ----------------------------------------------------------------------------
# Wrapper
# ----------------------------------------------------------------------------
def scaled_dot_product_attention(q, k, v, temperature, *, return_attn=True):
    """q: (B, Lq, Dk), k: (B, Lk, Dk), v: (B, Lk, Dv) -> (output, attn) or output."""
    B, Lq, Dk = q.shape
    Bk, Lk, Dk2 = k.shape
    Bv, Lk2, Dv = v.shape
    assert B == Bk == Bv and Dk == Dk2 and Lk == Lk2

    attn_dtype = q.dtype                      # align attn with inputs (halves bf16 writeback)
    in_bytes = jnp.dtype(q.dtype).itemsize
    attn_bytes = jnp.dtype(attn_dtype).itemsize

    # --- q-tile: full Lq when small; otherwise the largest of (512, 256, 128) dividing it
    #     (bigger tiles amortize per-step overhead, esp. on v5e/v6e's larger VMEM).
    if Lq <= 256:
        tq = Lq
    else:
        tq = next((t for t in (512, 256, 128) if Lq % t == 0), Lq)

    # --- per-step VMEM estimate (double-buffered blocks + f32 score temporaries).
    def vmem_estimate(bt):
        ins = 2 * bt * (tq * Dk + Lk * Dk + Lk * Dv) * in_bytes
        outs = 2 * bt * tq * Dv * in_bytes
        if return_attn:
            outs += 2 * bt * tq * Lk * attn_bytes
        tmp = 2 * bt * tq * Lk * 4            # f32 scores / exp intermediates
        return ins + outs + tmp

    VMEM_BUDGET = 40 * 1024 * 1024            # safe on v7x (64 MiB) and v5e/v6e (128 MiB)

    # --- batch fold for small shapes: batched einsum per step instead of tiny grid steps.
    Bt = 1
    if tq == Lq and Lq <= 128:
        for cand in (16, 8, 4, 2):
            if B % cand == 0 and vmem_estimate(cand) <= VMEM_BUDGET:
                Bt = cand
                break

    grid = (B // Bt, Lq // tq)

    kernel_fn = _sdpa_kernel if return_attn else _sdpa_kernel_no_attn
    kernel = functools.partial(kernel_fn, inv_temperature=1.0 / float(temperature))

    in_specs = [
        pl.BlockSpec((Bt, tq, Dk), lambda b, i: (b, i, 0)),
        pl.BlockSpec((Bt, Lk, Dk), lambda b, i: (b, 0, 0)),   # K/V constant along q-tile axis
        pl.BlockSpec((Bt, Lk, Dv), lambda b, i: (b, 0, 0)),
    ]
    out_shapes = [jax.ShapeDtypeStruct((B, Lq, Dv), q.dtype)]
    out_specs = [pl.BlockSpec((Bt, tq, Dv), lambda b, i: (b, i, 0))]
    if return_attn:
        # attn written directly in the caller's (B, Lq, Lk) layout — no wrapper transpose.
        out_shapes.append(jax.ShapeDtypeStruct((B, Lq, Lk), attn_dtype))
        out_specs.append(pl.BlockSpec((Bt, tq, Lk), lambda b, i: (b, i, 0)))

    # Raise the scoped VMEM limit only as far as the footprint estimate requires.
    vmem_limit = int(min(max(2 * vmem_estimate(Bt), 32 * 1024 * 1024), 64 * 1024 * 1024))

    results = pl.pallas_call(
        kernel,
        out_shape=tuple(out_shapes),
        grid_spec=pltpu.PrefetchScalarGridSpec(
            num_scalar_prefetch=0,
            grid=grid,
            in_specs=in_specs,
            out_specs=out_specs,
        ),
        compiler_params=pltpu.CompilerParams(
            dimension_semantics=("parallel", "parallel"),
            vmem_limit_bytes=vmem_limit,
        ),
    )(q, k, v)

    if return_attn:
        out, attn = results
        return out, attn
    (out,) = results
    return out


# ----------------------------------------------------------------------------
# Pure-JAX reference (for a light in-script sanity check)
# ----------------------------------------------------------------------------
def _sdpa_ref(q, k, v, temperature):
    scores = jnp.einsum("bqd,bkd->bqk", q, k) / temperature
    attn = jax.nn.softmax(scores, axis=2)
    out = jnp.einsum("bqk,bkd->bqd", attn, v)
    return out, attn


if __name__ == "__main__":
    # Small shapes consistent with the module: batch=2, seq=8, d_k=d_v=32.
    B, LQ, LK, DK, DV = 2, 8, 8, 32, 32
    TEMPERATURE = float(DK) ** 0.5

    root = jax.random.PRNGKey(0)
    kq, kk, kv = jax.random.split(root, 3)
    q = jax.random.normal(kq, (B, LQ, DK), jnp.float32)
    k = jax.random.normal(kk, (B, LK, DK), jnp.float32)
    v = jax.random.normal(kv, (B, LK, DV), jnp.float32)

    out, attn = scaled_dot_product_attention(q, k, v, TEMPERATURE)
    out_only = scaled_dot_product_attention(q, k, v, TEMPERATURE, return_attn=False)
    jax.block_until_ready((out, attn, out_only))

    assert out.shape == (B, LQ, DV)
    assert attn.shape == (B, LQ, LK)
    assert attn.dtype == q.dtype
    assert out_only.shape == (B, LQ, DV)

    out_ref, attn_ref = _sdpa_ref(q, k, v, TEMPERATURE)
    # Generous tolerance: approx EUP reciprocal in the softmax denominator.
    assert jnp.allclose(attn, attn_ref, rtol=1e-2, atol=1e-2)
    assert jnp.allclose(out, out_ref, rtol=1e-2, atol=1e-2)
    assert jnp.allclose(out_only, out_ref, rtol=1e-2, atol=1e-2)

    print("KERNEL_OK")
</pallas_src>

<mosaic_0001>
module attributes {stable_mosaic.version = 11 : i64} {
  func.func @_sdpa_kernel(%arg0: i32, %arg1: i32, %arg2: memref<2x8x32xf32, #tpu.memory_space<vmem>>, %arg3: memref<2x8x32xf32, #tpu.memory_space<vmem>>, %arg4: memref<2x8x32xf32, #tpu.memory_space<vmem>>, %arg5: memref<2x8x32xf32, #tpu.memory_space<vmem>>, %arg6: memref<2x8x8xf32, #tpu.memory_space<vmem>>) attributes {dimension_semantics = [#tpu.dimension_semantics<parallel>, #tpu.dimension_semantics<parallel>], iteration_bounds = array<i64: 1, 1>, scalar_prefetch = 0 : i64, scratch_operands = 0 : i64, tpu.core_type = #tpu.core_type<tc>, window_params = [{transform_indices = @transform_0, window_bounds = array<i64: 2, 8, 32>}, {transform_indices = @transform_1, window_bounds = array<i64: 2, 8, 32>}, {transform_indices = @transform_2, window_bounds = array<i64: 2, 8, 32>}, {transform_indices = @transform_3, window_bounds = array<i64: 2, 8, 32>}, {transform_indices = @transform_4, window_bounds = array<i64: 2, 8, 8>}]} {
    %c0 = arith.constant 0 : index
    %c0_0 = arith.constant 0 : index
    %c0_1 = arith.constant 0 : index
    %0 = vector.load %arg2[%c0, %c0_0, %c0_1] : memref<2x8x32xf32, #tpu.memory_space<vmem>>, vector<2x8x32xf32>
    %cst = arith.constant 0.176776692 : f32
    %1 = vector.broadcast %cst : f32 to vector<2x8x32xf32>
    %2 = arith.mulf %0, %1 : vector<2x8x32xf32>
    %c0_2 = arith.constant 0 : index
    %c0_3 = arith.constant 0 : index
    %c0_4 = arith.constant 0 : index
    %3 = vector.load %arg3[%c0_2, %c0_3, %c0_4] : memref<2x8x32xf32, #tpu.memory_space<vmem>>, vector<2x8x32xf32>
    "tpu.trace_start"() <{level = 10 : i32, message = "bqd,bkd->bqk"}> : () -> ()
    %cst_5 = arith.constant dense<0.000000e+00> : vector<2x8x8xf32>
    %4 = tpu.matmul %2, %3, %cst_5 {dimension_numbers = #tpu.dot_dimension_numbers<[2], [2], [1], [1], [0, 0, 0, 1, 1, 1], [0], [0]>} : vector<2x8x32xf32>, vector<2x8x32xf32>, vector<2x8x8xf32> -> vector<2x8x8xf32>
    "tpu.trace_stop"() : () -> ()
    %cst_6 = arith.constant dense<0xFF800000> : vector<2x8xf32>
    %5 = vector.multi_reduction <maximumf>, %4, %cst_6 [2] : vector<2x8x8xf32> to vector<2x8xf32>
    %6 = vector.shape_cast %5 : vector<2x8xf32> to vector<2x8x1xf32>
    %7 = vector.broadcast %6 : vector<2x8x1xf32> to vector<2x8x8xf32>
    %8 = arith.subf %4, %7 : vector<2x8x8xf32>
    %9 = math.exp %8 : vector<2x8x8xf32>
    %cst_7 = arith.constant dense<0.000000e+00> : vector<2x8xf32>
    %10 = vector.multi_reduction <add>, %9, %cst_7 [2] : vector<2x8x8xf32> to vector<2x8xf32>
    %11 = vector.shape_cast %10 : vector<2x8xf32> to vector<2x8x1xf32>
    %12 = tpu.reciprocal %11 {approx = true} : vector<2x8x1xf32> -> vector<2x8x1xf32>
    %13 = vector.broadcast %12 : vector<2x8x1xf32> to vector<2x8x8xf32>
    %14 = arith.mulf %9, %13 : vector<2x8x8xf32>
    %c0_8 = arith.constant 0 : index
    %c0_9 = arith.constant 0 : index
    %c0_10 = arith.constant 0 : index
    %15 = vector.load %arg6[%c0_8, %c0_9, %c0_10] : memref<2x8x8xf32, #tpu.memory_space<vmem>>, vector<2x8x8xf32>
    tpu.vector_store %arg6[%c0_8, %c0_9, %c0_10], %14 {strides = array<i32>} : memref<2x8x8xf32, #tpu.memory_space<vmem>>, vector<2x8x8xf32>,
    %c0_11 = arith.constant 0 : index
    %c0_12 = arith.constant 0 : index
    %c0_13 = arith.constant 0 : index
    %16 = vector.load %arg4[%c0_11, %c0_12, %c0_13] : memref<2x8x32xf32, #tpu.memory_space<vmem>>, vector<2x8x32xf32>
    "tpu.trace_start"() <{level = 10 : i32, message = "bqk,bkd->bqd"}> : () -> ()
    %cst_14 = arith.constant dense<0.000000e+00> : vector<2x8x32xf32>
    %17 = tpu.matmul %14, %16, %cst_14 {dimension_numbers = #tpu.dot_dimension_numbers<[2], [1], [1], [2], [0, 0, 0, 1, 1, 2], [0], [0]>} : vector<2x8x8xf32>, vector<2x8x32xf32>, vector<2x8x32xf32> -> vector<2x8x32xf32>
    "tpu.trace_stop"() : () -> ()
    %c0_15 = arith.constant 0 : index
    %c0_16 = arith.constant 0 : index
    %c0_17 = arith.constant 0 : index
    %18 = vector.load %arg5[%c0_15, %c0_16, %c0_17] : memref<2x8x32xf32, #tpu.memory_space<vmem>>, vector<2x8x32xf32>
    tpu.vector_store %arg5[%c0_15, %c0_16, %c0_17], %17 {strides = array<i32>} : memref<2x8x32xf32, #tpu.memory_space<vmem>>, vector<2x8x32xf32>,
    return
  }
  func.func @transform_0(%arg0: i32, %arg1: i32) -> (i32, i32, i32) {
    %c0_i32 = arith.constant 0 : i32
    %c0_i32_0 = arith.constant 0 : i32
    return %arg0, %arg1, %c0_i32 : i32, i32, i32
  }
  func.func @transform_1(%arg0: i32, %arg1: i32) -> (i32, i32, i32) {
    %c0_i32 = arith.constant 0 : i32
    %c0_i32_0 = arith.constant 0 : i32
    %c0_i32_1 = arith.constant 0 : i32
    return %arg0, %c0_i32, %c0_i32_0 : i32, i32, i32
  }
  func.func @transform_2(%arg0: i32, %arg1: i32) -> (i32, i32, i32) {
    %c0_i32 = arith.constant 0 : i32
    %c0_i32_0 = arith.constant 0 : i32
    %c0_i32_1 = arith.constant 0 : i32
    return %arg0, %c0_i32, %c0_i32_0 : i32, i32, i32
  }
  func.func @transform_3(%arg0: i32, %arg1: i32) -> (i32, i32, i32) {
    %c0_i32 = arith.constant 0 : i32
    %c0_i32_0 = arith.constant 0 : i32
    return %arg0, %arg1, %c0_i32 : i32, i32, i32
  }
  func.func @transform_4(%arg0: i32, %arg1: i32) -> (i32, i32, i32) {
    %c0_i32 = arith.constant 0 : i32
    %c0_i32_0 = arith.constant 0 : i32
    return %arg0, %arg1, %c0_i32 : i32, i32, i32
  }
}

</mosaic_0001>

<bundles_post_ra>
// kernel: tpu_custom_call.1
= control target key start
LH: loop header
LB: loop body
LE: loop exit
PB: predicated region body
PF: predicated region fallthrough
CT: control target
= control target key end

     0   :  { %10 = vsyncpa [#allocation3], 0  ;;  %s730_s0 = inlined_call_operand.hbm [shape: f32[2,8,32], index: 0, kind: input, shape index: {}]   ;;  %s731_s1 = inlined_call_operand.hbm [shape: f32[2,8,32], index: 1, kind: input, shape index: {}]   ;;  %s732_s2 = inlined_call_operand.hbm [shape: f32[2,8,32], index: 2, kind: input, shape index: {}]   ;;  %s733_s3 = inlined_call_operand.hbm [shape: f32[2,8,32], index: 3, kind: output, shape index: {0}]   ;;  %s734_s4 = inlined_call_operand.hbm [shape: f32[2,8,8], index: 4, kind: output, shape index: {1}]  }
   0x1   :  { %11 = vsyncpa [#allocation6], 0 }
   0x2   :  { %12 = vsyncpa [#allocation4], 0 }
   0x3   :  { %13 = vsyncpa [#allocation10], 0  ;;  %s596_s15 = smov [#allocation5]   ;;  %s597_s17 = smov [#allocation2]  }
   0x4   :  { %s31_s16 = sshll.u32 %s596_s15, 4  ;;  %s19_s18 = sshll.u32 %s597_s17, 4  ;;  %s32_s16 = int_to_ptr.vmem [resolvable:$true] %s31_s16  ;;  %s630_s18 = int_to_ptr.vmem [resolvable:$true] %s19_s18 }
   0x5   :  { %s478_s21 = scalar_lea.hbm %s731_s1, 256 }
   0x6   :  { %p479_p0 = scmp.ne.s32.totalorder %s731_s1, %s478_s21  ;;  %p482_p1 = scmp.lt.u32.totalorder %s478_s21, %s731_s1 }
   0x8   :  { %p484_p2 = pnand %p482_p1, %p479_p0 }
   0xa   :  { %487 = shalt.err (!%p484_p2)
}
   0xb   :  { %s488_s26 = scalar_lea.vmem %s32_s16, 256  ;;  %p493_p4 = scmp.lt.s32.totalorder %s32_s16, %s32_s16 }
   0xc   :  { %p489_p3 = scmp.ne.s32.totalorder %s32_s16, %s488_s26  ;;  %p494_p5 = scmp.lt.s32.totalorder %s488_s26, %s488_s26 }
   0xe   :  { %p495_p6 = por %p494_p5, %p493_p4 }
  0x10   :  { %p496_p7 = pnand %p495_p6, %p489_p3 }
  0x12   :  { %499 = shalt.err (!%p496_p7)
}
  0x13   :  { %s598_s27 = smov 128   ;;  %s599_s28 = smov 8  }
  0x14   :  { %37 = dma.hbm_to_vmem [thread:$0]  %s731_s1, 256, %s32_s16, [#allocation6], %s598_s27, %s598_s27, %s599_s28  }
  0x15   :  { %s500_s7 = scalar_lea.hbm %s730_s0, 256 }
  0x16   :  { %p501_p8 = scmp.ne.s32.totalorder %s730_s0, %s500_s7  ;;  %p504_p9 = scmp.lt.u32.totalorder %s500_s7, %s730_s0 }
  0x18   :  { %p506_p10 = pnand %p504_p9, %p501_p8 }
  0x1a   :  { %509 = shalt.err (!%p506_p10)
}
  0x1b   :  { %s510_s12 = scalar_lea.vmem %s630_s18, 256  ;;  %p515_p12 = scmp.lt.s32.totalorder %s630_s18, %s630_s18 }
  0x1c   :  { %p511_p11 = scmp.ne.s32.totalorder %s630_s18, %s510_s12  ;;  %p516_p13 = scmp.lt.s32.totalorder %s510_s12, %s510_s12 }
  0x1e   :  { %p517_p0 = por %p516_p13, %p515_p12 }
  0x20   :  { %p518_p1 = pnand %p517_p0, %p511_p11 }
  0x22   :  { %521 = shalt.err (!%p518_p1)
}
  0x23   :  { %25 = dma.hbm_to_vmem [thread:$0]  %s730_s0, 256, %s630_s18, [#allocation3], %s598_s27, %s598_s27, %s599_s28  }
  0x24   :  { %s600_s14 = smov [#allocation7]   ;;  %s522_s19 = scalar_lea.hbm %s732_s2, 256 }
  0x25   :  { %s43_s15 = sshll.u32 %s600_s14, 4  ;;  %p523_p2 = scmp.ne.s32.totalorder %s732_s2, %s522_s19  ;;  %s44_s15 = int_to_ptr.vmem [resolvable:$true] %s43_s15 }
  0x26   :  { %p526_p3 = scmp.lt.u32.totalorder %s522_s19, %s732_s2 }
  0x28   :  { %p528_p4 = pnand %p526_p3, %p523_p2 }
  0x2a   :  { %531 = shalt.err (!%p528_p4)
}
  0x2b   :  { %s532_s24 = scalar_lea.vmem %s44_s15, 256  ;;  %p537_p6 = scmp.lt.s32.totalorder %s44_s15, %s44_s15 }
  0x2c   :  { %p533_p5 = scmp.ne.s32.totalorder %s44_s15, %s532_s24  ;;  %p538_p7 = scmp.lt.s32.totalorder %s532_s24, %s532_s24 }
  0x2e   :  { %p539_p8 = por %p538_p7, %p537_p6 }
  0x30   :  { %p540_p9 = pnand %p539_p8, %p533_p5 }
  0x32   :  { %543 = shalt.err (!%p540_p9)
}
  0x33   :  { %49 = dma.hbm_to_vmem [thread:$0]  %s732_s2, 256, %s44_s15, [#allocation6], %s598_s27, %s598_s27, %s599_s28  }
  0x34   :  { %588 = dma.done.wait [#allocation3], 256  }
  0x35   :  { %589 = vsyncadd [#allocation3], 4294967040 }
  0x36   :  { %590 = dma.done.wait [#allocation6], 512  }
  0x37   :  { %591 = vsyncadd [#allocation6], 4294966784  ;;  %v601_v0 = vmov 0.0   ;;  %vm602_vm0 = vmmov 0   ;;  %vm65_vm1 = vcmask 261120   ;;  %v63_v1 = vld [vmem:[#allocation5] sm:$0xff] }
  0x38   :  { %441 = vmatprep.subr.mxu0 %v601_v0  ;;  %443 = vmatprep.mubr.msk.f32.mxu0 %vm602_vm0, %v601_v0  ;;  %v59_v2 = vld [vmem:[#allocation2] sm:$0xff]  ;;  %v64_v3 = vld [vmem:[#allocation5 + $0x8] sm:$0xff]  ;;  %v60_v5 = vld [vmem:[#allocation2 + $0x8] sm:$0xff]  ;;  %vm218_vm2 = vcmask 64512   ;;  %s603_s2 = smov [#allocation9]  }
  0x39   :  { %446 = vmatprep.subr.mxu1 %v601_v0  ;;  %448 = vmatprep.mubr.msk.f32.mxu1 %vm602_vm0, %v601_v0  ;;  %v61_v4 = vmul.f32 0.17677669, %v59_v2  ;;  %v62_v6 = vmul.f32 0.17677669, %v60_v5  ;;  %v243_v23 = vld [vmem:[#allocation7] sm:$0xff]  ;;  %v244_v24 = vld [vmem:[#allocation7 + $0x8] sm:$0xff] }
  0x3a   :  { %442 = vmatpush3.xpose.msk.msra.mxu0 %vm65_vm1, %v63_v1  ;;  %447 = vmatpush3.xpose.msk.msra.mxu1 %vm65_vm1, %v64_v3  ;;  %s410_s25 = sshll.u32 %s603_s2, 4  ;;  %s411_s25 = int_to_ptr.vmem [resolvable:$true] %s410_s25 }
  0x3b   :  { %451 = vmatprep.subr.mxu0 %v601_v0  ;;  %456 = vmatprep.subr.mxu1 %v601_v0  ;;  %s544_s26 = scalar_lea.vmem %s411_s25, 256  ;;  %p549_p11 = scmp.lt.s32.totalorder %s411_s25, %s411_s25 }
  0x3c   :  { %p545_p10 = scmp.ne.s32.totalorder %s411_s25, %s544_s26  ;;  %p550_p12 = scmp.lt.s32.totalorder %s544_s26, %s544_s26 }
  0x3d   :  { %444 = vmatmul.mubr.msk.f32.vlgmr.msra.gmra.mrb[0].mxu0 %vm65_vm1, %v61_v4  ;;  %449 = vmatmul.mubr.msk.f32.vlgmr.msra.gmra.mrb[0].mxu1 %vm65_vm1, %v62_v6 }
  0x3e   :  { %453 = vmatprep.mubr.msk.f32.mxu0 %vm602_vm0, %v601_v0  ;;  %458 = vmatprep.mubr.msk.f32.mxu1 %vm602_vm0, %v601_v0  ;;  %p551_p13 = por %p550_p12, %p549_p11 }
  0x3f   :  { %452 = vmatpush3.msra.mxu0 %v243_v23  ;;  %457 = vmatpush3.msra.mxu1 %v244_v24 }
  0x40   :  { %p552_p0 = pnand %p551_p13, %p545_p10 }
 0x110   :  { %v138_v7 = vpop.f32.mrb[0].mxu0  ;;  %v214_v8 = vpop.f32.mrb[0].mxu1 }
 0x111   :  { %v445_v9 = vpop.f32.mrb[1].mxu0  ;;  %v219_v10 = vsel %vm218_vm2, %v138_v7, -inf  ;;  %v450_v11 = vpop.f32.mrb[1].mxu1  ;;  %v222_v12 = vsel %vm218_vm2, %v214_v8, -inf }
 0x112   :  { %220 = vmax.xlane.f32.xlu0 %v219_v10 }
 0x116   :  { %223 = vmax.xlane.f32.xlu0 %v222_v12 }
 0x19f   :  { %v221_v13 = vpop.xlane.xlu0 %220 }
 0x1a0   :  { %v225_v14 = vsub.f32 %v138_v7, %v221_v13 }
 0x1a2   :  { %v227_v15 = vmul.f32 1.442695, %v225_v14 }
 0x1a3   :  { %v224_v16 = vpop.xlane.xlu0 %223 }
 0x1a4   :  { %470 = vpow2.f32 %v227_v15  ;;  %v226_v17 = vsub.f32 %v214_v8, %v224_v16 }
 0x1a6   :  { %v229_v18 = vmul.f32 1.442695, %v226_v17 }
 0x1a8   :  { %472 = vpow2.f32 %v229_v18 }
 0x1ae   :  { %v471_v19 = vpop.eup %470 }
 0x1af   :  { %v231_v20 = vsel %vm218_vm2, %v471_v19, 0.0 }
 0x1b0   :  { %232 = vadd.xlane.f32.xlu1 %v231_v20 }
 0x1b2   :  { %v473_v21 = vpop.eup %472 }
 0x1b3   :  { %v234_v22 = vsel %vm218_vm2, %v473_v21, 0.0 }
 0x1b4   :  { %235 = vadd.xlane.f32.xlu1 %v234_v22 }
 0x23d   :  { %v233_v25 = vpop.xlane.xlu1 %232 }
 0x23e   :  { %474 = vrcp.f32 %v233_v25 }
 0x241   :  { %v236_v26 = vpop.xlane.xlu1 %235 }
 0x242   :  { %476 = vrcp.f32 %v236_v26 }
 0x248   :  { %v475_v27 = vpop.eup %474 }
 0x249   :  { %v239_v28 = vmul.f32 %v475_v27, %v471_v19 }
 0x24b   :  { %241 = vst.msk [vmem:[#allocation9] sm:$0xff] %vm218_vm2, %v239_v28  ;;  %454 = vmatmul.mubr.msk.f32.vlgmr.msra.gmra.mrb[2].mxu0 %vm218_vm2, %v239_v28 }
 0x24c   :  { %v477_v29 = vpop.eup %476 }
 0x24d   :  { %v240_v30 = vmul.f32 %v477_v29, %v473_v21 }
 0x24f   :  { %242 = vst.msk [vmem:[#allocation9 + $0x8] sm:$0xff] %vm218_vm2, %v240_v30  ;;  %459 = vmatmul.mubr.msk.f32.vlgmr.msra.gmra.mrb[2].mxu1 %vm218_vm2, %v240_v30 }
 0x250   :  { %555 = shalt.err (!%p552_p0)
}
 0x251   :  { %s556_s5 = scalar_lea.hbm %s734_s4, 256 }
 0x252   :  { %p557_p1 = scmp.ne.s32.totalorder %s734_s4, %s556_s5  ;;  %p560_p2 = scmp.lt.u32.totalorder %s556_s5, %s734_s4 }
 0x254   :  { %p562_p3 = pnand %p560_p2, %p557_p1 }
 0x256   :  { %565 = shalt.err (!%p562_p3)
}
 0x257   :  { %416 = dma.vmem_to_hbm [thread:$0]  %s411_s25, 256, %s734_s4, [#allocation10], %s598_s27, %s598_s27, %s599_s28  }
 0x258   :  { %s604_s12 = smov [#allocation8]  }
 0x259   :  { %s398_s1 = sshll.u32 %s604_s12, 4  ;;  %s399_s1 = int_to_ptr.vmem [resolvable:$true] %s398_s1 }
 0x25a   :  { %s566_s13 = scalar_lea.vmem %s399_s1, 256  ;;  %p571_p5 = scmp.lt.s32.totalorder %s399_s1, %s399_s1 }
 0x25b   :  { %p567_p4 = scmp.ne.s32.totalorder %s399_s1, %s566_s13  ;;  %p572_p6 = scmp.lt.s32.totalorder %s566_s13, %s566_s13 }
 0x25d   :  { %p573_p7 = por %p572_p6, %p571_p5 }
 0x25f   :  { %p574_p8 = pnand %p573_p7, %p567_p4 }
 0x31e   :  { %v314_v31 = vpop.f32.mrb[2].mxu0 }
 0x31f   :  { %391 = vst.msk [vmem:[#allocation8] sm:$0xff] %vm65_vm1, %v314_v31  ;;  %v455_v32 = vpop.f32.mrb[3].mxu0 }
 0x322   :  { %v387_v33 = vpop.f32.mrb[2].mxu1 }
 0x323   :  { %392 = vst.msk [vmem:[#allocation8 + $0x8] sm:$0xff] %vm65_vm1, %v387_v33  ;;  %v460_v34 = vpop.f32.mrb[3].mxu1 }
 0x324   :  { %577 = shalt.err (!%p574_p8)
}
 0x325   :  { %s578_s15 = scalar_lea.hbm %s733_s3, 256 }
 0x326   :  { %p579_p9 = scmp.ne.s32.totalorder %s733_s3, %s578_s15  ;;  %p582_p10 = scmp.lt.u32.totalorder %s578_s15, %s733_s3 }
 0x328   :  { %p584_p11 = pnand %p582_p10, %p579_p9 }
 0x32a   :  { %587 = shalt.err (!%p584_p11)
}
 0x32b   :  { %404 = dma.vmem_to_hbm [thread:$0]  %s399_s1, 256, %s733_s3, [#allocation4], %s598_s27, %s598_s27, %s599_s28  }
 0x32c   :  { %592 = dma.done.wait [#allocation4], 256  }
 0x32d   :  { %593 = vsyncadd [#allocation4], 4294967040 }
 0x32e   :  { %594 = dma.done.wait [#allocation10], 256  }
 0x32f   :  { %595 = vsyncadd [#allocation10], 4294967040 }
 0x330   :  { %423 = vsyncpa [#allocation3], 1 }
 0x331   :  { %424 = vsyncpa [#allocation6], 1 }
 0x332   :  { %425 = vsyncpa [#allocation4], 1 }
 0x333   :  { %426 = vsyncpa [#allocation10], 1 }

</bundles_post_ra>
